<compile_context>
chip_gen: v7x
topology: tpu7x:2x2x1
jax: 0.10.0
libtpu: 0.0.40
codegen_flags: <defaults>
</compile_context>

<pallas_src>
from functools import partial

import jax
import jax.numpy as jnp
from jax import lax
from jax.experimental import pallas as pl
from jax.experimental.pallas import tpu as pltpu

BN_EPS = 1e-5


# ---------------------------------------------------------------------------
# helpers
# ---------------------------------------------------------------------------
def _round_up(x, m):
    return ((x + m - 1) // m) * m


def _pad2d(x, rows, cols):
    return jnp.pad(x, ((0, rows - x.shape[0]), (0, cols - x.shape[1])))


def _pad_vec(v, cols):
    return jnp.pad(v, (0, cols - v.shape[0])).reshape(1, -1).astype(jnp.float32)


def _nbytes(shape, dtype):
    n = 1
    for s in shape:
        n *= int(s)
    return n * jnp.dtype(dtype).itemsize


def _mosaic_params(semantics, block_bytes, scratch_bytes=0):
    # double-buffered pipeline blocks + scratch + headroom; capped at 48 MiB so
    # there is headroom on v7x (64 MiB physical VMEM); v5e/v6e have 128 MiB.
    limit = 2 * int(block_bytes) + int(scratch_bytes) + (8 << 20)
    limit = max(32 << 20, min(limit, 48 << 20))
    return pltpu.CompilerParams(dimension_semantics=semantics,
                                vmem_limit_bytes=int(limit))


def _cost(flops, nbytes):
    return pl.CostEstimate(flops=int(flops), transcendentals=0,
                           bytes_accessed=int(nbytes))


# ---------------------------------------------------------------------------
# KNN (plain JAX glue)
# TODO(synk): top-k and the data-dependent neighbor gather stay in plain JAX;
# an in-kernel DMA gather (PrefetchScalarGridSpec + pl.ANY + make_async_copy)
# would remove one more HBM copy but has no clean/simple Pallas path here.
# ---------------------------------------------------------------------------
def knn_jax(points, k):
    """points: (B, C_coord, P) -> idx: (B, P, k) nearest neighbors (excl. self)."""
    inner = -2.0 * jnp.einsum("bcp,bcq->bpq", points, points)
    xx = jnp.sum(points * points, axis=1)                       # (B, P)
    pairwise = -xx[:, :, None] - inner - xx[:, None, :]          # (B, P, P)
    _, idx = lax.top_k(pairwise, k + 1)
    return idx[:, :, 1:]


# ---------------------------------------------------------------------------
# Pallas kernels
# ---------------------------------------------------------------------------
def _first_kernel(tile_bp, has_sc):
    """Layer-0 conv (split-W, center term reused over the k neighbor blocks)
    + per-row-tile BN sum/sumsq (+ optional shortcut conv + its BN sums).
    Grid = (row_tile [parallel], neighbor j [arbitrary]).
    Padded rows of xn/xpt are zero -> their conv outputs are exactly zero, so
    no validity mask is needed in this pass."""
    rg = tile_bp // 8

    def kernel(*refs):
        if has_sc:
            (xn_ref, xpt_ref, w0n_ref, w0c_ref, wsc_ref,
             z_ref, s_ref, q_ref, scp_ref, scs_ref, scq_ref, center) = refs
        else:
            (xn_ref, xpt_ref, w0n_ref, w0c_ref,
             z_ref, s_ref, q_ref, center) = refs
        j = pl.program_id(1)

        @pl.when(j == 0)
        def _per_row_tile():
            s_ref[...] = jnp.zeros_like(s_ref)
            q_ref[...] = jnp.zeros_like(q_ref)
            # center contribution x_i @ (W_top - W_bot): once per row tile,
            # reused for all k neighbor blocks.
            xpt = xpt_ref[...]
            center[...] = jnp.dot(xpt, w0c_ref[...],
                                  preferred_element_type=jnp.float32)
            if has_sc:
                sc = jnp.dot(xpt, wsc_ref[...],
                             preferred_element_type=jnp.float32)
                scp_ref[...] = sc.astype(scp_ref.dtype)
                scs_ref[0] = jnp.sum(sc.reshape(rg, 8, -1), axis=0)
                scq_ref[0] = jnp.sum((sc * sc).reshape(rg, 8, -1), axis=0)

        z = jnp.dot(xn_ref[0], w0n_ref[...],
                    preferred_element_type=jnp.float32) + center[...]
        z_ref[0] = z.astype(z_ref.dtype)                  # compute_dtype store
        s_ref[0] += jnp.sum(z.reshape(rg, 8, -1), axis=0)
        q_ref[0] += jnp.sum((z * z).reshape(rg, 8, -1), axis=0)

    return kernel


def _conv_kernel(tile_bp, bp_true, bp_pad, compute_dtype):
    """Normalize previous layer (global-stat BN) + ReLU + 1x1 conv of the
    current layer + per-row-tile BN sum/sumsq.  The validity mask is emitted
    only when the row count actually has padding (static condition)."""
    rg = tile_bp // 8
    needs_mask = bp_pad != bp_true

    def kernel(zin_ref, scale_ref, shift_ref, w_ref, zout_ref, s_ref, q_ref):
        r = pl.program_id(0)
        j = pl.program_id(1)

        @pl.when(j == 0)
        def _init():
            s_ref[...] = jnp.zeros_like(s_ref)
            q_ref[...] = jnp.zeros_like(q_ref)

        y = jnp.maximum(zin_ref[0] * scale_ref[...] + shift_ref[...], 0.0)
        z = jnp.dot(y.astype(compute_dtype), w_ref[...],
                    preferred_element_type=jnp.float32)
        if needs_mask:
            rows = r * tile_bp + lax.broadcasted_iota(jnp.int32, (tile_bp, 1), 0)
            z = jnp.where(rows < bp_true, z, 0.0)   # keeps BN exact + stops cascade
        zout_ref[0] = z.astype(zout_ref.dtype)
        s_ref[0] += jnp.sum(z.reshape(rg, 8, -1), axis=0)
        q_ref[0] += jnp.sum((z * z).reshape(rg, 8, -1), axis=0)

    return kernel


def _final_kernel(k, has_sc):
    """Normalize+ReLU last layer, mean over the k neighbors (reduction axis),
    shortcut BN, residual add, final ReLU."""
    inv_k = 1.0 / k

    def kernel(*refs):
        if has_sc:
            (zin_ref, scale_ref, shift_ref, sc_ref,
             sc_scale_ref, sc_shift_ref, out_ref, acc) = refs
        else:
            (zin_ref, scale_ref, shift_ref, sc_ref, out_ref, acc) = refs
        j = pl.program_id(1)

        @pl.when(j == 0)
        def _init():
            acc[...] = jnp.zeros_like(acc)

        acc[...] += jnp.maximum(zin_ref[0] * scale_ref[...] + shift_ref[...], 0.0)

        @pl.when(j == k - 1)
        def _finalize():
            fts = acc[...] * inv_k
            sc = sc_ref[...].astype(jnp.float32)
            if has_sc:
                sc = sc * sc_scale_ref[...] + sc_shift_ref[...]
            out_ref[...] = jnp.maximum(sc + fts, 0.0)

    return kernel


# ---------------------------------------------------------------------------
# Wrapper
# ---------------------------------------------------------------------------
@partial(jax.jit, static_argnums=(3,),
         static_argnames=("compute_dtype", "tile_rows", "eps"))
def edge_conv_block(points, features, params, k, *,
                    compute_dtype=jnp.bfloat16, tile_rows=2048, eps=BN_EPS):
    B, C_in, P = features.shape
    out_feats = [w.shape[1] for w in params["conv_w"]]
    num_layers = len(out_feats)
    F_last = out_feats[-1]
    has_sc = "sc_w" in params

    BP = B * P
    tile_bp = _round_up(min(int(tile_rows), _round_up(BP, 16)), 16)
    BP_pad = _round_up(BP, tile_bp)
    n_rt = BP_pad // tile_bp
    grid = (n_rt, k)
    # keep the gather / input-channel axis narrow (C_in is small in
    # ParticleNet): pad only to the 16-row packing granularity, not to 128.
    C_p = _round_up(C_in, 16)
    F_pad = [_round_up(f, 128) for f in out_feats]
    F0, FL = F_pad[0], F_pad[-1]
    n_edge = float(k * BP)       # BN2d population (b, p, j)
    n_pt = float(BP)             # BN1d population (b, p)
    itm = jnp.dtype(compute_dtype).itemsize

    # ---- graph-feature gather (plain JAX glue), j-major, compute dtype -----
    idx = knn_jax(points, k)                                       # (B, P, k)
    feats_t = jnp.transpose(features, (0, 2, 1)).astype(compute_dtype)  # (B,P,C)
    idx_j = jnp.transpose(idx, (2, 0, 1))                          # (k, B, P)
    xn = feats_t[jnp.arange(B)[None, :, None], idx_j, :]           # (k,B,P,C)
    xn = xn.reshape(k, BP, C_in)
    xpt = feats_t.reshape(BP, C_in)
    xn_p = jnp.pad(xn, ((0, 0), (0, BP_pad - BP), (0, C_p - C_in)))
    xpt_p = jnp.pad(xpt, ((0, BP_pad - BP), (0, C_p - C_in)))

    # ---- parameters: split W0, pad to lane/packing-dense shapes ------------
    w0 = params["conv_w"][0]                                       # (2*C_in, F0)
    w0_top, w0_bot = w0[:C_in], w0[C_in:]
    w0n = _pad2d(w0_bot, C_p, F0).astype(compute_dtype)
    w0c = _pad2d(w0_top - w0_bot, C_p, F0).astype(compute_dtype)
    w_mid = [_pad2d(params["conv_w"][l], F_pad[l - 1], F_pad[l]
                    ).astype(compute_dtype) for l in range(1, num_layers)]
    gam = [_pad_vec(params["bn_g"][l], F_pad[l]) for l in range(num_layers)]
    bet = [_pad_vec(params["bn_b"][l], F_pad[l]) for l in range(num_layers)]
    if has_sc:
        wsc = _pad2d(params["sc_w"], C_p, FL).astype(compute_dtype)
        sc_gam = _pad_vec(params["sc_bn_g"], FL)
        sc_bet = _pad_vec(params["sc_bn_b"], FL)

    def affine(s_part, q_part, n, g, b):
        # host-side reduction of the per-row-tile partial sums (wider and more
        # robust than a single grid-resident running sum).
        s = jnp.sum(s_part, axis=(0, 1)).reshape(1, -1)
        q = jnp.sum(q_part, axis=(0, 1)).reshape(1, -1)
        mu = s / n
        var = jnp.maximum(q / n - mu * mu, 0.0)
        scale = g * lax.rsqrt(var + eps)
        return scale, b - mu * scale

    vec = lambda F: pl.BlockSpec((1, F), lambda r, j: (0, 0))
    bnp = lambda F: pl.BlockSpec((1, 8, F), lambda r, j: (r, 0, 0))
    bn_shape = lambda F: jax.ShapeDtypeStruct((n_rt, 8, F), jnp.float32)

    # ---- pass 0: layer-0 conv + BN sums (+ shortcut conv + its BN sums) ----
    in_specs = [
        pl.BlockSpec((1, tile_bp, C_p), lambda r, j: (j, r, 0)),    # xn
        pl.BlockSpec((tile_bp, C_p), lambda r, j: (r, 0)),          # xpt
        pl.BlockSpec((C_p, F0), lambda r, j: (0, 0)),               # W0 nbr
        pl.BlockSpec((C_p, F0), lambda r, j: (0, 0)),               # W0 ctr
    ]
    args = [xn_p, xpt_p, w0n, w0c]
    out_shape = [jax.ShapeDtypeStruct((k, BP_pad, F0), compute_dtype),
                 bn_shape(F0), bn_shape(F0)]
    out_specs = [pl.BlockSpec((1, tile_bp, F0), lambda r, j: (j, r, 0)),
                 bnp(F0), bnp(F0)]
    if has_sc:
        in_specs.append(pl.BlockSpec((C_p, FL), lambda r, j: (0, 0)))
        args.append(wsc)
        out_shape += [jax.ShapeDtypeStruct((BP_pad, FL), compute_dtype),
                      bn_shape(FL), bn_shape(FL)]
        out_specs += [pl.BlockSpec((tile_bp, FL), lambda r, j: (r, 0)),
                      bnp(FL), bnp(FL)]

    blk_bytes = (2 * _nbytes((tile_bp, C_p), compute_dtype)
                 + 2 * _nbytes((C_p, F0), compute_dtype)
                 + _nbytes((tile_bp, F0), compute_dtype)
                 + ((_nbytes((C_p, FL), compute_dtype)
                     + _nbytes((tile_bp, FL), compute_dtype)) if has_sc else 0))
    flops = (2 * k * BP_pad * C_p * F0
             + 2 * BP_pad * C_p * (F0 + (FL if has_sc else 0)))
    nbytes = (xn_p.size * itm + xpt_p.size * itm
              + k * BP_pad * F0 * itm + (BP_pad * FL * itm if has_sc else 0))
    outs = pl.pallas_call(
        _first_kernel(tile_bp, has_sc),
        grid=grid,
        in_specs=in_specs,
        out_specs=tuple(out_specs),
        out_shape=tuple(out_shape),
        scratch_shapes=[pltpu.VMEM((tile_bp, F0), jnp.float32)],
        compiler_params=_mosaic_params(
            ("parallel", "arbitrary"), blk_bytes,
            _nbytes((tile_bp, F0), jnp.float32)),
        cost_estimate=_cost(flops, nbytes),
    )(*args)
    if has_sc:
        z, s, q, sc_pre, sc_s, sc_q = outs
    else:
        z, s, q = outs
    scale, shift = affine(s, q, n_edge, gam[0], bet[0])

    # ---- passes 1..L-1: normalize prev + ReLU + conv + BN sums -------------
    for l in range(1, num_layers):
        Fi, Fo = F_pad[l - 1], F_pad[l]
        blk_bytes = (_nbytes((tile_bp, Fi), compute_dtype)
                     + _nbytes((tile_bp, Fo), compute_dtype)
                     + _nbytes((Fi, Fo), compute_dtype))
        z, s, q = pl.pallas_call(
            _conv_kernel(tile_bp, BP, BP_pad, compute_dtype),
            grid=grid,
            in_specs=[pl.BlockSpec((1, tile_bp, Fi), lambda r, j: (j, r, 0)),
                      vec(Fi), vec(Fi),
                      pl.BlockSpec((Fi, Fo), lambda r, j: (0, 0))],
            out_specs=(pl.BlockSpec((1, tile_bp, Fo), lambda r, j: (j, r, 0)),
                       bnp(Fo), bnp(Fo)),
            out_shape=(jax.ShapeDtypeStruct((k, BP_pad, Fo), compute_dtype),
                       bn_shape(Fo), bn_shape(Fo)),
            compiler_params=_mosaic_params(("parallel", "arbitrary"),
                                           blk_bytes),
            cost_estimate=_cost(2 * k * BP_pad * Fi * Fo,
                                k * BP_pad * (Fi + Fo) * itm + Fi * Fo * itm),
        )(z, scale, shift, w_mid[l - 1])
        scale, shift = affine(s, q, n_edge, gam[l], bet[l])

    # ---- final pass: normalize+ReLU, mean over k, shortcut, residual -------
    if has_sc:
        sc_scale, sc_shift = affine(sc_s, sc_q, n_pt, sc_gam, sc_bet)
        sc_in = sc_pre
    else:
        # identity shortcut (C_in == F_last): raw features, lane-padded
        sc_in = jnp.pad(xpt, ((0, BP_pad - BP), (0, FL - C_in)))

    in_specs = [pl.BlockSpec((1, tile_bp, FL), lambda r, j: (j, r, 0)),
                vec(FL), vec(FL),
                pl.BlockSpec((tile_bp, FL), lambda r, j: (r, 0))]
    args = [z, scale, shift, sc_in]
    if has_sc:
        in_specs += [vec(FL), vec(FL)]
        args += [sc_scale, sc_shift]
    blk_bytes = (2 * _nbytes((tile_bp, FL), compute_dtype)
                 + _nbytes((tile_bp, FL), jnp.float32))
    out_pad = pl.pallas_call(
        _final_kernel(k, has_sc),
        grid=grid,
        in_specs=in_specs,
        out_specs=pl.BlockSpec((tile_bp, FL), lambda r, j: (r, 0)),
        out_shape=jax.ShapeDtypeStruct((BP_pad, FL), jnp.float32),
        scratch_shapes=[pltpu.VMEM((tile_bp, FL), jnp.float32)],
        compiler_params=_mosaic_params(("parallel", "arbitrary"), blk_bytes,
                                       _nbytes((tile_bp, FL), jnp.float32)),
        cost_estimate=_cost(2 * k * BP_pad * FL,
                            (k + 1) * BP_pad * FL * itm + BP_pad * FL * 4),
    )(*args)

    out = out_pad[:BP, :F_last].reshape(B, P, F_last)
    return jnp.transpose(out, (0, 2, 1))                          # (B, F_last, P)


# ---------------------------------------------------------------------------
# Pure-JAX f32 reference (mirrors the PyTorch forward, training-mode BN)
# ---------------------------------------------------------------------------
def ref_forward(points, features, params, k, eps=BN_EPS):
    B, C_in, P = features.shape
    idx = knn_jax(points, k)
    feats_t = jnp.transpose(features, (0, 2, 1))                  # (B, P, C_in)
    nbr = jax.vmap(lambda ft, ix: ft[ix])(feats_t, idx)           # (B, P, k, C)
    xc = jnp.broadcast_to(feats_t[:, :, None, :], nbr.shape)
    y = jnp.concatenate([xc, nbr - xc], axis=-1)
    for w, g, b in zip(params["conv_w"], params["bn_g"], params["bn_b"]):
        y = jnp.einsum("bpkc,cf->bpkf", y, w)
        mu = jnp.mean(y, axis=(0, 1, 2), keepdims=True)
        var = jnp.mean((y - mu) ** 2, axis=(0, 1, 2), keepdims=True)
        y = (y - mu) * (g / jnp.sqrt(var + eps)) + b
        y = jnp.maximum(y, 0.0)
    fts = jnp.mean(y, axis=2)
    if "sc_w" in params:
        sc = jnp.einsum("bpc,cf->bpf", feats_t, params["sc_w"])
        mu = jnp.mean(sc, axis=(0, 1), keepdims=True)
        var = jnp.mean((sc - mu) ** 2, axis=(0, 1), keepdims=True)
        sc = (sc - mu) * (params["sc_bn_g"] / jnp.sqrt(var + eps)) + params["sc_bn_b"]
    else:
        sc = feats_t
    out = jnp.maximum(sc + fts, 0.0)
    return jnp.transpose(out, (0, 2, 1))


# ---------------------------------------------------------------------------
# Main
# ---------------------------------------------------------------------------
if __name__ == "__main__":
    key = jax.random.PRNGKey(0)

    def make_params(pkey, c_in, out_feats):
        ks = iter(jax.random.split(pkey, 3 * len(out_feats) + 3))
        p = {"conv_w": [], "bn_g": [], "bn_b": []}
        c_prev = 2 * c_in
        for f in out_feats:
            p["conv_w"].append(0.2 * jax.random.normal(next(ks), (c_prev, f), jnp.float32))
            p["bn_g"].append(1.0 + 0.1 * jax.random.normal(next(ks), (f,), jnp.float32))
            p["bn_b"].append(0.1 * jax.random.normal(next(ks), (f,), jnp.float32))
            c_prev = f
        if out_feats[-1] != c_in:   # shortcut branch (Conv1d + BN1d), as in the module
            p["sc_w"] = 0.2 * jax.random.normal(next(ks), (c_in, out_feats[-1]), jnp.float32)
            p["sc_bn_g"] = 1.0 + 0.1 * jax.random.normal(next(ks), (out_feats[-1],), jnp.float32)
            p["sc_bn_b"] = 0.1 * jax.random.normal(next(ks), (out_feats[-1],), jnp.float32)
        return p

    # case 1: conv shortcut branch, B*P multiple of 16 (no row padding)
    B, C_coord, C_in, P, K = 2, 3, 4, 16, 4
    out_feats = (8, 16)
    k1, k2, k3 = jax.random.split(key, 3)
    points = jax.random.normal(k1, (B, C_coord, P), jnp.float32)
    features = jax.random.normal(k2, (B, C_in, P), jnp.float32)
    params = make_params(k3, C_in, out_feats)
    ref = ref_forward(points, features, params, K)

    # bf16-MXU production path (f32 accumulation / BN stats, bf16 activations)
    out_bf16 = jax.block_until_ready(edge_conv_block(points, features, params, K))
    assert out_bf16.shape == (B, out_feats[-1], P), out_bf16.shape
    if not jnp.allclose(out_bf16, ref, rtol=5e-2, atol=5e-2):
        raise AssertionError("bf16 Pallas kernel output mismatch vs JAX reference")

    # all-f32 path: tight check of the tiling / split-W / streamed-BN logic.
    out_f32 = jax.block_until_ready(
        edge_conv_block(points, features, params, K, compute_dtype=jnp.float32))
    if not jnp.allclose(out_f32, ref, rtol=1e-3, atol=1e-3):
        raise AssertionError("f32 Pallas kernel output mismatch vs JAX reference")

    # case 2: identity shortcut (C_in == out_feats[-1]) and B*P = 24 -> padded
    # to 32 rows, exercising the masked-BN (padded-row) path.
    P2 = 12
    out_feats2 = (8, 4)
    k4, k5, k6 = jax.random.split(k3, 3)
    points2 = jax.random.normal(k4, (B, C_coord, P2), jnp.float32)
    features2 = jax.random.normal(k5, (B, C_in, P2), jnp.float32)
    params2 = make_params(k6, C_in, out_feats2)
    ref2 = ref_forward(points2, features2, params2, K)
    out2 = jax.block_until_ready(
        edge_conv_block(points2, features2, params2, K, compute_dtype=jnp.float32))
    if not jnp.allclose(out2, ref2, rtol=1e-3, atol=1e-3):
        raise AssertionError("f32 padded-row / identity-shortcut path mismatch")

    print("KERNEL_OK")
</pallas_src>

<mosaic_0001>
module attributes {stable_mosaic.version = 11 : i64} {
  func.func @kernel(%arg0: i32, %arg1: i32, %arg2: memref<1x32x16xbf16, #tpu.memory_space<vmem>>, %arg3: memref<32x16xbf16, #tpu.memory_space<vmem>>, %arg4: memref<16x128xbf16, #tpu.memory_space<vmem>>, %arg5: memref<16x128xbf16, #tpu.memory_space<vmem>>, %arg6: memref<16x128xbf16, #tpu.memory_space<vmem>>, %arg7: memref<1x32x128xbf16, #tpu.memory_space<vmem>>, %arg8: memref<1x8x128xf32, #tpu.memory_space<vmem>>, %arg9: memref<1x8x128xf32, #tpu.memory_space<vmem>>, %arg10: memref<32x128xbf16, #tpu.memory_space<vmem>>, %arg11: memref<1x8x128xf32, #tpu.memory_space<vmem>>, %arg12: memref<1x8x128xf32, #tpu.memory_space<vmem>>, %arg13: memref<32x128xf32, #tpu.memory_space<vmem>>) attributes {dimension_semantics = [#tpu.dimension_semantics<parallel>, #tpu.dimension_semantics<arbitrary>], iteration_bounds = array<i64: 1, 4>, scalar_prefetch = 0 : i64, scratch_operands = 1 : i64, tpu.core_type = #tpu.core_type<tc>, window_params = [{transform_indices = @transform_0, window_bounds = array<i64: 1, 32, 16>}, {transform_indices = @transform_1, window_bounds = array<i64: 32, 16>}, {pipeline_mode = #tpu.pipeline_mode<synchronous>, transform_indices = @transform_2, window_bounds = array<i64: 16, 128>}, {pipeline_mode = #tpu.pipeline_mode<synchronous>, transform_indices = @transform_3, window_bounds = array<i64: 16, 128>}, {pipeline_mode = #tpu.pipeline_mode<synchronous>, transform_indices = @transform_4, window_bounds = array<i64: 16, 128>}, {transform_indices = @transform_5, window_bounds = array<i64: 1, 32, 128>}, {transform_indices = @transform_6, window_bounds = array<i64: 1, 8, 128>}, {transform_indices = @transform_7, window_bounds = array<i64: 1, 8, 128>}, {transform_indices = @transform_8, window_bounds = array<i64: 32, 128>}, {transform_indices = @transform_9, window_bounds = array<i64: 1, 8, 128>}, {transform_indices = @transform_10, window_bounds = array<i64: 1, 8, 128>}]} {
    %c0_i32 = arith.constant 0 : i32
    %0 = arith.cmpi eq, %arg1, %c0_i32 : i32
    %1 = arith.extui %0 : i1 to i32
    %c0_i32_0 = arith.constant 0 : i32
    %2 = arith.cmpi ne, %1, %c0_i32_0 : i32
    scf.if %2 {
      %cst_24 = arith.constant 0.000000e+00 : f32
      %30 = vector.broadcast %cst_24 : f32 to vector<1x8x128xf32>
      %c0_25 = arith.constant 0 : index
      %c0_26 = arith.constant 0 : index
      %c0_27 = arith.constant 0 : index
      %31 = vector.load %arg8[%c0_25, %c0_26, %c0_27] : memref<1x8x128xf32, #tpu.memory_space<vmem>>, vector<1x8x128xf32>
      tpu.vector_store %arg8[%c0_25, %c0_26, %c0_27], %30 {strides = array<i32>} : memref<1x8x128xf32, #tpu.memory_space<vmem>>, vector<1x8x128xf32>,
      %cst_28 = arith.constant 0.000000e+00 : f32
      %32 = vector.broadcast %cst_28 : f32 to vector<1x8x128xf32>
      %c0_29 = arith.constant 0 : index
      %c0_30 = arith.constant 0 : index
      %c0_31 = arith.constant 0 : index
      %33 = vector.load %arg9[%c0_29, %c0_30, %c0_31] : memref<1x8x128xf32, #tpu.memory_space<vmem>>, vector<1x8x128xf32>
      tpu.vector_store %arg9[%c0_29, %c0_30, %c0_31], %32 {strides = array<i32>} : memref<1x8x128xf32, #tpu.memory_space<vmem>>, vector<1x8x128xf32>,
      %c0_32 = arith.constant 0 : index
      %c0_33 = arith.constant 0 : index
      %34 = vector.load %arg3[%c0_32, %c0_33] : memref<32x16xbf16, #tpu.memory_space<vmem>>, vector<32x16xbf16>
      %c0_34 = arith.constant 0 : index
      %c0_35 = arith.constant 0 : index
      %35 = vector.load %arg5[%c0_34, %c0_35] : memref<16x128xbf16, #tpu.memory_space<vmem>>, vector<16x128xbf16>
      %cst_36 = arith.constant dense<0.000000e+00> : vector<32x128xf32>
      %36 = tpu.matmul %34, %35, %cst_36 {dimension_numbers = #tpu.dot_dimension_numbers<[1], [0], [0], [1], [0, 0, 1, 1], [], []>} : vector<32x16xbf16>, vector<16x128xbf16>, vector<32x128xf32> -> vector<32x128xf32>
      %c0_37 = arith.constant 0 : index
      %c0_38 = arith.constant 0 : index
      %37 = vector.load %arg13[%c0_37, %c0_38] : memref<32x128xf32, #tpu.memory_space<vmem>>, vector<32x128xf32>
      tpu.vector_store %arg13[%c0_37, %c0_38], %36 {strides = array<i32>} : memref<32x128xf32, #tpu.memory_space<vmem>>, vector<32x128xf32>,
      %c0_39 = arith.constant 0 : index
      %c0_40 = arith.constant 0 : index
      %38 = vector.load %arg6[%c0_39, %c0_40] : memref<16x128xbf16, #tpu.memory_space<vmem>>, vector<16x128xbf16>
      %cst_41 = arith.constant dense<0.000000e+00> : vector<32x128xf32>
      %39 = tpu.matmul %34, %38, %cst_41 {dimension_numbers = #tpu.dot_dimension_numbers<[1], [0], [0], [1], [0, 0, 1, 1], [], []>} : vector<32x16xbf16>, vector<16x128xbf16>, vector<32x128xf32> -> vector<32x128xf32>
      %40 = arith.truncf %39 : vector<32x128xf32> to vector<32x128xbf16>
      %c0_42 = arith.constant 0 : index
      %c0_43 = arith.constant 0 : index
      %41 = vector.load %arg10[%c0_42, %c0_43] : memref<32x128xbf16, #tpu.memory_space<vmem>>, vector<32x128xbf16>
      tpu.vector_store %arg10[%c0_42, %c0_43], %40 {strides = array<i32>} : memref<32x128xbf16, #tpu.memory_space<vmem>>, vector<32x128xbf16>,
      %42 = vector.shape_cast %39 : vector<32x128xf32> to vector<4x8x128xf32>
      %cst_44 = arith.constant dense<0.000000e+00> : vector<8x128xf32>
      %43 = vector.multi_reduction <add>, %42, %cst_44 [0] : vector<4x8x128xf32> to vector<8x128xf32>
      %c0_45 = arith.constant 0 : index
      %c0_46 = arith.constant 0 : index
      %c0_47 = arith.constant 0 : index
      %44 = vector.load %arg11[%c0_45, %c0_46, %c0_47] : memref<1x8x128xf32, #tpu.memory_space<vmem>>, vector<1x8x128xf32>
      %45 = vector.shape_cast %44 : vector<1x8x128xf32> to vector<8x128xf32>
      %46 = vector.shape_cast %43 : vector<8x128xf32> to vector<1x8x128xf32>
      tpu.vector_store %arg11[%c0_45, %c0_46, %c0_47], %46 {strides = array<i32>} : memref<1x8x128xf32, #tpu.memory_space<vmem>>, vector<1x8x128xf32>,
      %47 = arith.mulf %39, %39 : vector<32x128xf32>
      %48 = vector.shape_cast %47 : vector<32x128xf32> to vector<4x8x128xf32>
      %cst_48 = arith.constant dense<0.000000e+00> : vector<8x128xf32>
      %49 = vector.multi_reduction <add>, %48, %cst_48 [0] : vector<4x8x128xf32> to vector<8x128xf32>
      %c0_49 = arith.constant 0 : index
      %c0_50 = arith.constant 0 : index
      %c0_51 = arith.constant 0 : index
      %50 = vector.load %arg12[%c0_49, %c0_50, %c0_51] : memref<1x8x128xf32, #tpu.memory_space<vmem>>, vector<1x8x128xf32>
      %51 = vector.shape_cast %50 : vector<1x8x128xf32> to vector<8x128xf32>
      %52 = vector.shape_cast %49 : vector<8x128xf32> to vector<1x8x128xf32>
      tpu.vector_store %arg12[%c0_49, %c0_50, %c0_51], %52 {strides = array<i32>} : memref<1x8x128xf32, #tpu.memory_space<vmem>>, vector<1x8x128xf32>,
    } else {
    }
    %c0 = arith.constant 0 : index
    %c0_1 = arith.constant 0 : index
    %c0_2 = arith.constant 0 : index
    %3 = vector.load %arg2[%c0, %c0_1, %c0_2] : memref<1x32x16xbf16, #tpu.memory_space<vmem>>, vector<1x32x16xbf16>
    %4 = vector.shape_cast %3 : vector<1x32x16xbf16> to vector<32x16xbf16>
    %c0_3 = arith.constant 0 : index
    %c0_4 = arith.constant 0 : index
    %5 = vector.load %arg4[%c0_3, %c0_4] : memref<16x128xbf16, #tpu.memory_space<vmem>>, vector<16x128xbf16>
    %cst = arith.constant dense<0.000000e+00> : vector<32x128xf32>
    %6 = tpu.matmul %4, %5, %cst {dimension_numbers = #tpu.dot_dimension_numbers<[1], [0], [0], [1], [0, 0, 1, 1], [], []>} : vector<32x16xbf16>, vector<16x128xbf16>, vector<32x128xf32> -> vector<32x128xf32>
    %c0_5 = arith.constant 0 : index
    %c0_6 = arith.constant 0 : index
    %7 = vector.load %arg13[%c0_5, %c0_6] : memref<32x128xf32, #tpu.memory_space<vmem>>, vector<32x128xf32>
    %8 = arith.addf %6, %7 : vector<32x128xf32>
    %9 = arith.truncf %8 : vector<32x128xf32> to vector<32x128xbf16>
    %c0_7 = arith.constant 0 : index
    %c0_8 = arith.constant 0 : index
    %c0_9 = arith.constant 0 : index
    %10 = vector.load %arg7[%c0_7, %c0_8, %c0_9] : memref<1x32x128xbf16, #tpu.memory_space<vmem>>, vector<1x32x128xbf16>
    %11 = vector.shape_cast %10 : vector<1x32x128xbf16> to vector<32x128xbf16>
    %12 = vector.shape_cast %9 : vector<32x128xbf16> to vector<1x32x128xbf16>
    tpu.vector_store %arg7[%c0_7, %c0_8, %c0_9], %12 {strides = array<i32>} : memref<1x32x128xbf16, #tpu.memory_space<vmem>>, vector<1x32x128xbf16>,
    %c0_10 = arith.constant 0 : index
    %c0_11 = arith.constant 0 : index
    %c0_12 = arith.constant 0 : index
    %13 = vector.load %arg8[%c0_10, %c0_11, %c0_12] : memref<1x8x128xf32, #tpu.memory_space<vmem>>, vector<1x8x128xf32>
    %14 = vector.shape_cast %13 : vector<1x8x128xf32> to vector<8x128xf32>
    %15 = vector.shape_cast %8 : vector<32x128xf32> to vector<4x8x128xf32>
    %cst_13 = arith.constant dense<0.000000e+00> : vector<8x128xf32>
    %16 = vector.multi_reduction <add>, %15, %cst_13 [0] : vector<4x8x128xf32> to vector<8x128xf32>
    %17 = arith.addf %14, %16 : vector<8x128xf32>
    %c0_14 = arith.constant 0 : index
    %c0_15 = arith.constant 0 : index
    %c0_16 = arith.constant 0 : index
    %18 = vector.load %arg8[%c0_14, %c0_15, %c0_16] : memref<1x8x128xf32, #tpu.memory_space<vmem>>, vector<1x8x128xf32>
    %19 = vector.shape_cast %18 : vector<1x8x128xf32> to vector<8x128xf32>
    %20 = vector.shape_cast %17 : vector<8x128xf32> to vector<1x8x128xf32>
    tpu.vector_store %arg8[%c0_14, %c0_15, %c0_16], %20 {strides = array<i32>} : memref<1x8x128xf32, #tpu.memory_space<vmem>>, vector<1x8x128xf32>,
    %c0_17 = arith.constant 0 : index
    %c0_18 = arith.constant 0 : index
    %c0_19 = arith.constant 0 : index
    %21 = vector.load %arg9[%c0_17, %c0_18, %c0_19] : memref<1x8x128xf32, #tpu.memory_space<vmem>>, vector<1x8x128xf32>
    %22 = vector.shape_cast %21 : vector<1x8x128xf32> to vector<8x128xf32>
    %23 = arith.mulf %8, %8 : vector<32x128xf32>
    %24 = vector.shape_cast %23 : vector<32x128xf32> to vector<4x8x128xf32>
    %cst_20 = arith.constant dense<0.000000e+00> : vector<8x128xf32>
    %25 = vector.multi_reduction <add>, %24, %cst_20 [0] : vector<4x8x128xf32> to vector<8x128xf32>
    %26 = arith.addf %22, %25 : vector<8x128xf32>
    %c0_21 = arith.constant 0 : index
    %c0_22 = arith.constant 0 : index
    %c0_23 = arith.constant 0 : index
    %27 = vector.load %arg9[%c0_21, %c0_22, %c0_23] : memref<1x8x128xf32, #tpu.memory_space<vmem>>, vector<1x8x128xf32>
    %28 = vector.shape_cast %27 : vector<1x8x128xf32> to vector<8x128xf32>
    %29 = vector.shape_cast %26 : vector<8x128xf32> to vector<1x8x128xf32>
    tpu.vector_store %arg9[%c0_21, %c0_22, %c0_23], %29 {strides = array<i32>} : memref<1x8x128xf32, #tpu.memory_space<vmem>>, vector<1x8x128xf32>,
    return
  }
  func.func @transform_0(%arg0: i32, %arg1: i32) -> (i32, i32, i32) {
    %c0_i32 = arith.constant 0 : i32
    %c0_i32_0 = arith.constant 0 : i32
    return %arg1, %arg0, %c0_i32 : i32, i32, i32
  }
  func.func @transform_1(%arg0: i32, %arg1: i32) -> (i32, i32) {
    %c0_i32 = arith.constant 0 : i32
    %c0_i32_0 = arith.constant 0 : i32
    return %arg0, %c0_i32 : i32, i32
  }
  func.func @transform_2(%arg0: i32, %arg1: i32) -> (i32, i32) {
    %c0_i32 = arith.constant 0 : i32
    %c0_i32_0 = arith.constant 0 : i32
    %c0_i32_1 = arith.constant 0 : i32
    return %c0_i32, %c0_i32_0 : i32, i32
  }
  func.func @transform_3(%arg0: i32, %arg1: i32) -> (i32, i32) {
    %c0_i32 = arith.constant 0 : i32
    %c0_i32_0 = arith.constant 0 : i32
    %c0_i32_1 = arith.constant 0 : i32
    return %c0_i32, %c0_i32_0 : i32, i32
  }
  func.func @transform_4(%arg0: i32, %arg1: i32) -> (i32, i32) {
    %c0_i32 = arith.constant 0 : i32
    %c0_i32_0 = arith.constant 0 : i32
    %c0_i32_1 = arith.constant 0 : i32
    return %c0_i32, %c0_i32_0 : i32, i32
  }
  func.func @transform_5(%arg0: i32, %arg1: i32) -> (i32, i32, i32) {
    %c0_i32 = arith.constant 0 : i32
    %c0_i32_0 = arith.constant 0 : i32
    return %arg1, %arg0, %c0_i32 : i32, i32, i32
  }
  func.func @transform_6(%arg0: i32, %arg1: i32) -> (i32, i32, i32) {
    %c0_i32 = arith.constant 0 : i32
    %c0_i32_0 = arith.constant 0 : i32
    %c0_i32_1 = arith.constant 0 : i32
    return %arg0, %c0_i32, %c0_i32_0 : i32, i32, i32
  }
  func.func @transform_7(%arg0: i32, %arg1: i32) -> (i32, i32, i32) {
    %c0_i32 = arith.constant 0 : i32
    %c0_i32_0 = arith.constant 0 : i32
    %c0_i32_1 = arith.constant 0 : i32
    return %arg0, %c0_i32, %c0_i32_0 : i32, i32, i32
  }
  func.func @transform_8(%arg0: i32, %arg1: i32) -> (i32, i32) {
    %c0_i32 = arith.constant 0 : i32
    %c0_i32_0 = arith.constant 0 : i32
    return %arg0, %c0_i32 : i32, i32
  }
  func.func @transform_9(%arg0: i32, %arg1: i32) -> (i32, i32, i32) {
    %c0_i32 = arith.constant 0 : i32
    %c0_i32_0 = arith.constant 0 : i32
    %c0_i32_1 = arith.constant 0 : i32
    return %arg0, %c0_i32, %c0_i32_0 : i32, i32, i32
  }
  func.func @transform_10(%arg0: i32, %arg1: i32) -> (i32, i32, i32) {
    %c0_i32 = arith.constant 0 : i32
    %c0_i32_0 = arith.constant 0 : i32
    %c0_i32_1 = arith.constant 0 : i32
    return %arg0, %c0_i32, %c0_i32_0 : i32, i32, i32
  }
}

module attributes {stable_mosaic.version = 11 : i64} {
  func.func @kernel(%arg0: i32, %arg1: i32, %arg2: memref<1x32x128xbf16, #tpu.memory_space<vmem>>, %arg3: memref<1x128xf32, #tpu.memory_space<vmem>>, %arg4: memref<1x128xf32, #tpu.memory_space<vmem>>, %arg5: memref<128x128xbf16, #tpu.memory_space<vmem>>, %arg6: memref<1x32x128xbf16, #tpu.memory_space<vmem>>, %arg7: memref<1x8x128xf32, #tpu.memory_space<vmem>>, %arg8: memref<1x8x128xf32, #tpu.memory_space<vmem>>) attributes {dimension_semantics = [#tpu.dimension_semantics<parallel>, #tpu.dimension_semantics<arbitrary>], iteration_bounds = array<i64: 1, 4>, scalar_prefetch = 0 : i64, scratch_operands = 0 : i64, tpu.core_type = #tpu.core_type<tc>, window_params = [{transform_indices = @transform_0, window_bounds = array<i64: 1, 32, 128>}, {pipeline_mode = #tpu.pipeline_mode<synchronous>, transform_indices = @transform_1, window_bounds = array<i64: 1, 128>}, {pipeline_mode = #tpu.pipeline_mode<synchronous>, transform_indices = @transform_2, window_bounds = array<i64: 1, 128>}, {pipeline_mode = #tpu.pipeline_mode<synchronous>, transform_indices = @transform_3, window_bounds = array<i64: 128, 128>}, {transform_indices = @transform_4, window_bounds = array<i64: 1, 32, 128>}, {transform_indices = @transform_5, window_bounds = array<i64: 1, 8, 128>}, {transform_indices = @transform_6, window_bounds = array<i64: 1, 8, 128>}]} {
    %c0_i32 = arith.constant 0 : i32
    %0 = arith.cmpi eq, %arg1, %c0_i32 : i32
    %1 = arith.extui %0 : i1 to i32
    %c0_i32_0 = arith.constant 0 : i32
    %2 = arith.cmpi ne, %1, %c0_i32_0 : i32
    scf.if %2 {
      %cst_27 = arith.constant 0.000000e+00 : f32
      %38 = vector.broadcast %cst_27 : f32 to vector<1x8x128xf32>
      %c0_28 = arith.constant 0 : index
      %c0_29 = arith.constant 0 : index
      %c0_30 = arith.constant 0 : index
      %39 = vector.load %arg7[%c0_28, %c0_29, %c0_30] : memref<1x8x128xf32, #tpu.memory_space<vmem>>, vector<1x8x128xf32>
      tpu.vector_store %arg7[%c0_28, %c0_29, %c0_30], %38 {strides = array<i32>} : memref<1x8x128xf32, #tpu.memory_space<vmem>>, vector<1x8x128xf32>,
      %cst_31 = arith.constant 0.000000e+00 : f32
      %40 = vector.broadcast %cst_31 : f32 to vector<1x8x128xf32>
      %c0_32 = arith.constant 0 : index
      %c0_33 = arith.constant 0 : index
      %c0_34 = arith.constant 0 : index
      %41 = vector.load %arg8[%c0_32, %c0_33, %c0_34] : memref<1x8x128xf32, #tpu.memory_space<vmem>>, vector<1x8x128xf32>
      tpu.vector_store %arg8[%c0_32, %c0_33, %c0_34], %40 {strides = array<i32>} : memref<1x8x128xf32, #tpu.memory_space<vmem>>, vector<1x8x128xf32>,
    } else {
    }
    %c0 = arith.constant 0 : index
    %c0_1 = arith.constant 0 : index
    %c0_2 = arith.constant 0 : index
    %3 = vector.load %arg2[%c0, %c0_1, %c0_2] : memref<1x32x128xbf16, #tpu.memory_space<vmem>>, vector<1x32x128xbf16>
    %4 = vector.shape_cast %3 : vector<1x32x128xbf16> to vector<32x128xbf16>
    %c0_3 = arith.constant 0 : index
    %c0_4 = arith.constant 0 : index
    %5 = vector.load %arg3[%c0_3, %c0_4] : memref<1x128xf32, #tpu.memory_space<vmem>>, vector<1x128xf32>
    %6 = arith.extf %4 : vector<32x128xbf16> to vector<32x128xf32>
    %7 = vector.broadcast %5 : vector<1x128xf32> to vector<32x128xf32>
    %8 = arith.mulf %6, %7 : vector<32x128xf32>
    %c0_5 = arith.constant 0 : index
    %c0_6 = arith.constant 0 : index
    %9 = vector.load %arg4[%c0_5, %c0_6] : memref<1x128xf32, #tpu.memory_space<vmem>>, vector<1x128xf32>
    %10 = vector.broadcast %9 : vector<1x128xf32> to vector<32x128xf32>
    %11 = arith.addf %8, %10 : vector<32x128xf32>
    %cst = arith.constant 0.000000e+00 : f32
    %12 = vector.broadcast %cst : f32 to vector<32x128xf32>
    %13 = arith.maximumf %11, %12 : vector<32x128xf32>
    %14 = arith.truncf %13 : vector<32x128xf32> to vector<32x128xbf16>
    %c0_7 = arith.constant 0 : index
    %c0_8 = arith.constant 0 : index
    %15 = vector.load %arg5[%c0_7, %c0_8] : memref<128x128xbf16, #tpu.memory_space<vmem>>, vector<128x128xbf16>
    %cst_9 = arith.constant dense<0.000000e+00> : vector<32x128xf32>
    %16 = tpu.matmul %14, %15, %cst_9 {dimension_numbers = #tpu.dot_dimension_numbers<[1], [0], [0], [1], [0, 0, 1, 1], [], []>} : vector<32x128xbf16>, vector<128x128xbf16>, vector<32x128xf32> -> vector<32x128xf32>
    %17 = arith.truncf %16 : vector<32x128xf32> to vector<32x128xbf16>
    %c0_10 = arith.constant 0 : index
    %c0_11 = arith.constant 0 : index
    %c0_12 = arith.constant 0 : index
    %18 = vector.load %arg6[%c0_10, %c0_11, %c0_12] : memref<1x32x128xbf16, #tpu.memory_space<vmem>>, vector<1x32x128xbf16>
    %19 = vector.shape_cast %18 : vector<1x32x128xbf16> to vector<32x128xbf16>
    %20 = vector.shape_cast %17 : vector<32x128xbf16> to vector<1x32x128xbf16>
    tpu.vector_store %arg6[%c0_10, %c0_11, %c0_12], %20 {strides = array<i32>} : memref<1x32x128xbf16, #tpu.memory_space<vmem>>, vector<1x32x128xbf16>,
    %c0_13 = arith.constant 0 : index
    %c0_14 = arith.constant 0 : index
    %c0_15 = arith.constant 0 : index
    %21 = vector.load %arg7[%c0_13, %c0_14, %c0_15] : memref<1x8x128xf32, #tpu.memory_space<vmem>>, vector<1x8x128xf32>
    %22 = vector.shape_cast %21 : vector<1x8x128xf32> to vector<8x128xf32>
    %23 = vector.shape_cast %16 : vector<32x128xf32> to vector<4x8x128xf32>
    %cst_16 = arith.constant dense<0.000000e+00> : vector<8x128xf32>
    %24 = vector.multi_reduction <add>, %23, %cst_16 [0] : vector<4x8x128xf32> to vector<8x128xf32>
    %25 = arith.addf %22, %24 : vector<8x128xf32>
    %c0_17 = arith.constant 0 : index
    %c0_18 = arith.constant 0 : index
    %c0_19 = arith.constant 0 : index
    %26 = vector.load %arg7[%c0_17, %c0_18, %c0_19] : memref<1x8x128xf32, #tpu.memory_space<vmem>>, vector<1x8x128xf32>
    %27 = vector.shape_cast %26 : vector<1x8x128xf32> to vector<8x128xf32>
    %28 = vector.shape_cast %25 : vector<8x128xf32> to vector<1x8x128xf32>
    tpu.vector_store %arg7[%c0_17, %c0_18, %c0_19], %28 {strides = array<i32>} : memref<1x8x128xf32, #tpu.memory_space<vmem>>, vector<1x8x128xf32>,
    %c0_20 = arith.constant 0 : index
    %c0_21 = arith.constant 0 : index
    %c0_22 = arith.constant 0 : index
    %29 = vector.load %arg8[%c0_20, %c0_21, %c0_22] : memref<1x8x128xf32, #tpu.memory_space<vmem>>, vector<1x8x128xf32>
    %30 = vector.shape_cast %29 : vector<1x8x128xf32> to vector<8x128xf32>
    %31 = arith.mulf %16, %16 : vector<32x128xf32>
    %32 = vector.shape_cast %31 : vector<32x128xf32> to vector<4x8x128xf32>
    %cst_23 = arith.constant dense<0.000000e+00> : vector<8x128xf32>
    %33 = vector.multi_reduction <add>, %32, %cst_23 [0] : vector<4x8x128xf32> to vector<8x128xf32>
    %34 = arith.addf %30, %33 : vector<8x128xf32>
    %c0_24 = arith.constant 0 : index
    %c0_25 = arith.constant 0 : index
    %c0_26 = arith.constant 0 : index
    %35 = vector.load %arg8[%c0_24, %c0_25, %c0_26] : memref<1x8x128xf32, #tpu.memory_space<vmem>>, vector<1x8x128xf32>
    %36 = vector.shape_cast %35 : vector<1x8x128xf32> to vector<8x128xf32>
    %37 = vector.shape_cast %34 : vector<8x128xf32> to vector<1x8x128xf32>
    tpu.vector_store %arg8[%c0_24, %c0_25, %c0_26], %37 {strides = array<i32>} : memref<1x8x128xf32, #tpu.memory_space<vmem>>, vector<1x8x128xf32>,
    return
  }
  func.func @transform_0(%arg0: i32, %arg1: i32) -> (i32, i32, i32) {
    %c0_i32 = arith.constant 0 : i32
    %c0_i32_0 = arith.constant 0 : i32
    return %arg1, %arg0, %c0_i32 : i32, i32, i32
  }
  func.func @transform_1(%arg0: i32, %arg1: i32) -> (i32, i32) {
    %c0_i32 = arith.constant 0 : i32
    %c0_i32_0 = arith.constant 0 : i32
    %c0_i32_1 = arith.constant 0 : i32
    return %c0_i32, %c0_i32_0 : i32, i32
  }
  func.func @transform_2(%arg0: i32, %arg1: i32) -> (i32, i32) {
    %c0_i32 = arith.constant 0 : i32
    %c0_i32_0 = arith.constant 0 : i32
    %c0_i32_1 = arith.constant 0 : i32
    return %c0_i32, %c0_i32_0 : i32, i32
  }
  func.func @transform_3(%arg0: i32, %arg1: i32) -> (i32, i32) {
    %c0_i32 = arith.constant 0 : i32
    %c0_i32_0 = arith.constant 0 : i32
    %c0_i32_1 = arith.constant 0 : i32
    return %c0_i32, %c0_i32_0 : i32, i32
  }
  func.func @transform_4(%arg0: i32, %arg1: i32) -> (i32, i32, i32) {
    %c0_i32 = arith.constant 0 : i32
    %c0_i32_0 = arith.constant 0 : i32
    return %arg1, %arg0, %c0_i32 : i32, i32, i32
  }
  func.func @transform_5(%arg0: i32, %arg1: i32) -> (i32, i32, i32) {
    %c0_i32 = arith.constant 0 : i32
    %c0_i32_0 = arith.constant 0 : i32
    %c0_i32_1 = arith.constant 0 : i32
    return %arg0, %c0_i32, %c0_i32_0 : i32, i32, i32
  }
  func.func @transform_6(%arg0: i32, %arg1: i32) -> (i32, i32, i32) {
    %c0_i32 = arith.constant 0 : i32
    %c0_i32_0 = arith.constant 0 : i32
    %c0_i32_1 = arith.constant 0 : i32
    return %arg0, %c0_i32, %c0_i32_0 : i32, i32, i32
  }
}

module attributes {stable_mosaic.version = 11 : i64} {
  func.func @kernel(%arg0: i32, %arg1: i32, %arg2: memref<1x32x128xbf16, #tpu.memory_space<vmem>>, %arg3: memref<1x128xf32, #tpu.memory_space<vmem>>, %arg4: memref<1x128xf32, #tpu.memory_space<vmem>>, %arg5: memref<32x128xbf16, #tpu.memory_space<vmem>>, %arg6: memref<1x128xf32, #tpu.memory_space<vmem>>, %arg7: memref<1x128xf32, #tpu.memory_space<vmem>>, %arg8: memref<32x128xf32, #tpu.memory_space<vmem>>, %arg9: memref<32x128xf32, #tpu.memory_space<vmem>>) attributes {dimension_semantics = [#tpu.dimension_semantics<parallel>, #tpu.dimension_semantics<arbitrary>], iteration_bounds = array<i64: 1, 4>, scalar_prefetch = 0 : i64, scratch_operands = 1 : i64, tpu.core_type = #tpu.core_type<tc>, window_params = [{transform_indices = @transform_0, window_bounds = array<i64: 1, 32, 128>}, {pipeline_mode = #tpu.pipeline_mode<synchronous>, transform_indices = @transform_1, window_bounds = array<i64: 1, 128>}, {pipeline_mode = #tpu.pipeline_mode<synchronous>, transform_indices = @transform_2, window_bounds = array<i64: 1, 128>}, {transform_indices = @transform_3, window_bounds = array<i64: 32, 128>}, {pipeline_mode = #tpu.pipeline_mode<synchronous>, transform_indices = @transform_4, window_bounds = array<i64: 1, 128>}, {pipeline_mode = #tpu.pipeline_mode<synchronous>, transform_indices = @transform_5, window_bounds = array<i64: 1, 128>}, {transform_indices = @transform_6, window_bounds = array<i64: 32, 128>}]} {
    %c0_i32 = arith.constant 0 : i32
    %0 = arith.cmpi eq, %arg1, %c0_i32 : i32
    %1 = arith.extui %0 : i1 to i32
    %c0_i32_0 = arith.constant 0 : i32
    %2 = arith.cmpi ne, %1, %c0_i32_0 : i32
    scf.if %2 {
      %cst_12 = arith.constant 0.000000e+00 : f32
      %20 = vector.broadcast %cst_12 : f32 to vector<32x128xf32>
      %c0_13 = arith.constant 0 : index
      %c0_14 = arith.constant 0 : index
      %21 = vector.load %arg9[%c0_13, %c0_14] : memref<32x128xf32, #tpu.memory_space<vmem>>, vector<32x128xf32>
      tpu.vector_store %arg9[%c0_13, %c0_14], %20 {strides = array<i32>} : memref<32x128xf32, #tpu.memory_space<vmem>>, vector<32x128xf32>,
    } else {
    }
    %c0 = arith.constant 0 : index
    %c0_1 = arith.constant 0 : index
    %3 = vector.load %arg9[%c0, %c0_1] : memref<32x128xf32, #tpu.memory_space<vmem>>, vector<32x128xf32>
    %c0_2 = arith.constant 0 : index
    %c0_3 = arith.constant 0 : index
    %c0_4 = arith.constant 0 : index
    %4 = vector.load %arg2[%c0_2, %c0_3, %c0_4] : memref<1x32x128xbf16, #tpu.memory_space<vmem>>, vector<1x32x128xbf16>
    %5 = vector.shape_cast %4 : vector<1x32x128xbf16> to vector<32x128xbf16>
    %c0_5 = arith.constant 0 : index
    %c0_6 = arith.constant 0 : index
    %6 = vector.load %arg3[%c0_5, %c0_6] : memref<1x128xf32, #tpu.memory_space<vmem>>, vector<1x128xf32>
    %7 = arith.extf %5 : vector<32x128xbf16> to vector<32x128xf32>
    %8 = vector.broadcast %6 : vector<1x128xf32> to vector<32x128xf32>
    %9 = arith.mulf %7, %8 : vector<32x128xf32>
    %c0_7 = arith.constant 0 : index
    %c0_8 = arith.constant 0 : index
    %10 = vector.load %arg4[%c0_7, %c0_8] : memref<1x128xf32, #tpu.memory_space<vmem>>, vector<1x128xf32>
    %11 = vector.broadcast %10 : vector<1x128xf32> to vector<32x128xf32>
    %12 = arith.addf %9, %11 : vector<32x128xf32>
    %cst = arith.constant 0.000000e+00 : f32
    %13 = vector.broadcast %cst : f32 to vector<32x128xf32>
    %14 = arith.maximumf %12, %13 : vector<32x128xf32>
    %15 = arith.addf %3, %14 : vector<32x128xf32>
    %c0_9 = arith.constant 0 : index
    %c0_10 = arith.constant 0 : index
    %16 = vector.load %arg9[%c0_9, %c0_10] : memref<32x128xf32, #tpu.memory_space<vmem>>, vector<32x128xf32>
    tpu.vector_store %arg9[%c0_9, %c0_10], %15 {strides = array<i32>} : memref<32x128xf32, #tpu.memory_space<vmem>>, vector<32x128xf32>,
    %c3_i32 = arith.constant 3 : i32
    %17 = arith.cmpi eq, %arg1, %c3_i32 : i32
    %18 = arith.extui %17 : i1 to i32
    %c0_i32_11 = arith.constant 0 : i32
    %19 = arith.cmpi ne, %18, %c0_i32_11 : i32
    scf.if %19 {
      %c0_12 = arith.constant 0 : index
      %c0_13 = arith.constant 0 : index
      %20 = vector.load %arg9[%c0_12, %c0_13] : memref<32x128xf32, #tpu.memory_space<vmem>>, vector<32x128xf32>
      %cst_14 = arith.constant 2.500000e-01 : f32
      %21 = vector.broadcast %cst_14 : f32 to vector<32x128xf32>
      %22 = arith.mulf %20, %21 : vector<32x128xf32>
      %c0_15 = arith.constant 0 : index
      %c0_16 = arith.constant 0 : index
      %23 = vector.load %arg5[%c0_15, %c0_16] : memref<32x128xbf16, #tpu.memory_space<vmem>>, vector<32x128xbf16>
      %24 = arith.extf %23 : vector<32x128xbf16> to vector<32x128xf32>
      %c0_17 = arith.constant 0 : index
      %c0_18 = arith.constant 0 : index
      %25 = vector.load %arg6[%c0_17, %c0_18] : memref<1x128xf32, #tpu.memory_space<vmem>>, vector<1x128xf32>
      %26 = vector.broadcast %25 : vector<1x128xf32> to vector<32x128xf32>
      %27 = arith.mulf %24, %26 : vector<32x128xf32>
      %c0_19 = arith.constant 0 : index
      %c0_20 = arith.constant 0 : index
      %28 = vector.load %arg7[%c0_19, %c0_20] : memref<1x128xf32, #tpu.memory_space<vmem>>, vector<1x128xf32>
      %29 = vector.broadcast %28 : vector<1x128xf32> to vector<32x128xf32>
      %30 = arith.addf %27, %29 : vector<32x128xf32>
      %31 = arith.addf %30, %22 : vector<32x128xf32>
      %cst_21 = arith.constant 0.000000e+00 : f32
      %32 = vector.broadcast %cst_21 : f32 to vector<32x128xf32>
      %33 = arith.maximumf %31, %32 : vector<32x128xf32>
      %c0_22 = arith.constant 0 : index
      %c0_23 = arith.constant 0 : index
      %34 = vector.load %arg8[%c0_22, %c0_23] : memref<32x128xf32, #tpu.memory_space<vmem>>, vector<32x128xf32>
      tpu.vector_store %arg8[%c0_22, %c0_23], %33 {strides = array<i32>} : memref<32x128xf32, #tpu.memory_space<vmem>>, vector<32x128xf32>,
    } else {
    }
    return
  }
  func.func @transform_0(%arg0: i32, %arg1: i32) -> (i32, i32, i32) {
    %c0_i32 = arith.constant 0 : i32
    %c0_i32_0 = arith.constant 0 : i32
    return %arg1, %arg0, %c0_i32 : i32, i32, i32
  }
  func.func @transform_1(%arg0: i32, %arg1: i32) -> (i32, i32) {
    %c0_i32 = arith.constant 0 : i32
    %c0_i32_0 = arith.constant 0 : i32
    %c0_i32_1 = arith.constant 0 : i32
    return %c0_i32, %c0_i32_0 : i32, i32
  }
  func.func @transform_2(%arg0: i32, %arg1: i32) -> (i32, i32) {
    %c0_i32 = arith.constant 0 : i32
    %c0_i32_0 = arith.constant 0 : i32
    %c0_i32_1 = arith.constant 0 : i32
    return %c0_i32, %c0_i32_0 : i32, i32
  }
  func.func @transform_3(%arg0: i32, %arg1: i32) -> (i32, i32) {
    %c0_i32 = arith.constant 0 : i32
    %c0_i32_0 = arith.constant 0 : i32
    return %arg0, %c0_i32 : i32, i32
  }
  func.func @transform_4(%arg0: i32, %arg1: i32) -> (i32, i32) {
    %c0_i32 = arith.constant 0 : i32
    %c0_i32_0 = arith.constant 0 : i32
    %c0_i32_1 = arith.constant 0 : i32
    return %c0_i32, %c0_i32_0 : i32, i32
  }
  func.func @transform_5(%arg0: i32, %arg1: i32) -> (i32, i32) {
    %c0_i32 = arith.constant 0 : i32
    %c0_i32_0 = arith.constant 0 : i32
    %c0_i32_1 = arith.constant 0 : i32
    return %c0_i32, %c0_i32_0 : i32, i32
  }
  func.func @transform_6(%arg0: i32, %arg1: i32) -> (i32, i32) {
    %c0_i32 = arith.constant 0 : i32
    %c0_i32_0 = arith.constant 0 : i32
    return %arg0, %c0_i32 : i32, i32
  }
}

</mosaic_0001>

<bundles_post_ra>
// kernel: neg.5
= control target key start
LH: loop header
LB: loop body
LE: loop exit
PB: predicated region body
PF: predicated region fallthrough
CT: control target
= control target key end

     0   :  { %s24_s0 = inlined_call_operand.vmem [shape: f32[2,16], index: 0, kind: input, shape index: {}]   ;;  %s25_s1 = inlined_call_operand.vmem [shape: f32[2,16], index: 1, kind: output, shape index: {}]  }
   0x1   :  { %v2_v0 = vld [vmem:[%s24_s0] sm:$0x3] }
   0x2   :  { %v5_v1 = vxor.u32 2147483648, %v2_v0 }
   0x4   :  { %7 = vst [vmem:[%s25_s1] sm:$0x3] %v5_v1 }

// kernel: edge_conv_block.4
= control target key start
LH: loop header
LB: loop body
LE: loop exit
PB: predicated region body
PF: predicated region fallthrough
CT: control target
= control target key end

     0   :  { %s824_s21 = smov 0   ;;  %s826_s22 = smov 0   ;;  %s909_s0 = inlined_call_operand.vmem [shape: bf16[4,32,128], index: 0, kind: input, shape index: {}]   ;;  %s910_s1 = inlined_call_operand.vmem [shape: f32[1,128], index: 1, kind: input, shape index: {}]   ;;  %s911_s2 = inlined_call_operand.vmem [shape: f32[1,128], index: 2, kind: input, shape index: {}]   ;;  %s912_s3 = inlined_call_operand.vmem [shape: bf16[128,128], index: 3, kind: input, shape index: {}]   ;;  %s913_s4 = inlined_call_operand.vmem [shape: bf16[4,32,128], index: 4, kind: output, shape index: {0}]   ;;  %s914_s5 = inlined_call_operand.vmem [shape: f32[1,8,128], index: 5, kind: output, shape index: {1}]   ;;  %s915_s6 = inlined_call_operand.vmem [shape: f32[1,8,128], index: 6, kind: output, shape index: {2}]  }
   0x1   :  { %s828_s23 = smov 0  }
   0x2 LB: > { %s26_s24 = sadd.s32 1, %s782_s22  ;;  %p651_p0 = scmp.ge.s32.totalorder %s786_s23, 1  ;;  %s786_s23 = sphi %s828_s23, %s17_s23   ;;  %s782_s22 = sphi %s826_s22, %s917_s22   ;;  %s778_s21 = sphi %s824_s21, %s916_s21  }
   0x3   : > { %p27_p1 = scmp.ge.s32.totalorder %s26_s24, 4  ;;  %p238_p2 = scmp.lt.s32.totalorder %s786_s23, 5 }
   0x5   : > { %s919_s24 = smov (%p27_p1, %s26_s24), 0  ;;  %p239_p3 = pnand %p651_p0, %p238_p2 }
   0x6   : > { %p285_p4 = scmp.lt.s32.totalorder (!%p239_p3), %s778_s21, 3  ;;  %p656_p5 = scmp.ne.s32.totalorder (!%p239_p3), %s778_s21, 0 }
   0x7   : > { %242 = sbr.rel (%p239_p3) target bundleno = 281 (0x119), region = 36 }
   0xe   : > { %s286_s25 = scalar_select %p285_p4, %s778_s21, 3 }
   0xf   : > { %316 = sbr.rel (%p656_p5) target bundleno = 22 (0x16), region = 40  ;;  %v788_v0 = vmov (!%p656_p5), 0.0  }
  0x10   : > { %s675_s26 = sshll.u32 %s286_s25, 4  ;;  %317 = vst [vmem:[%s914_s5] sm:$0xff] (!%p656_p5), %v788_v0  ;;  %318 = vst [vmem:[%s915_s6] sm:$0xff] (!%p656_p5), %v788_v0 }
  0x11   : > { %s292_s29 = scalar_lea.vmem %s909_s0, %s675_s26  ;;  %s848_s8 = scalar_lea.vmem %s913_s4, %s675_s26 }
  0x16 PF: > { %v756_v1 = vld [vmem:[%s912_s3] sm:$0xff]   ;;  %v757_v2 = vld [vmem:[%s912_s3 + $0x8] sm:$0xff]   ;;  %v758_v3 = vld [vmem:[%s912_s3 + $0x10] sm:$0xff]  }
  0x17   : > { %711 = vmatprep.subr.bf16.mxu0 %v756_v1  ;;  %v759_v4 = vld [vmem:[%s912_s3 + $0x18] sm:$0xff]   ;;  %v682_v5 = vld [vmem:[%s292_s29] sm:$0xff]   ;;  %v699_v12 = vld [vmem:[%s292_s29 + $0x8] sm:$0xff]  }
  0x18   : > { %712 = vmatpush3.bf16.msra.mxu0 %v756_v1  ;;  %v657_v6 = vld [vmem:[%s910_s1] ss:$0 sm:$0xff]  ;;  %v683_v7 = vunpack.c.l.bf16 %v682_v5  ;;  %v684_v8 = vunpack.c.h.bf16 %v682_v5  ;;  %v687_v16 = vunpack.c.l.bf16 %v699_v12  ;;  %v688_v17 = vunpack.c.h.bf16 %v699_v12  ;;  %v761_v20 = vld [vmem:[%s912_s3 + $0x28] sm:$0xff]   ;;  %v762_v24 = vld [vmem:[%s912_s3 + $0x30] sm:$0xff]  }
  0x19   : > { %713 = vmatprep.subr.bf16.mxu0 %v757_v2  ;;  %v658_v9 = vld [vmem:[%s911_s2] ss:$0 sm:$0xff]  ;;  %v763_v27 = vld [vmem:[%s912_s3 + $0x38] sm:$0xff]  }
  0x1a   : > { %v334_v10 = vmul.f32 %v683_v7, %v657_v6  ;;  %v335_v11 = vmul.f32 %v684_v8, %v657_v6  ;;  %v760_v13 = vld [vmem:[%s912_s3 + $0x20] sm:$0xff]   ;;  %v336_v22 = vmul.f32 %v687_v16, %v657_v6  ;;  %v337_v23 = vmul.f32 %v688_v17, %v657_v6 }
  0x1b   : > { %v488_v43 = vld [vmem:[%s914_s5] sm:$0xff] }
  0x1c   : > { %714 = vmatpush3.bf16.msra.mxu0 %v757_v2  ;;  %v345_v14 = vadd.f32 %v658_v9, %v334_v10  ;;  %v346_v15 = vadd.f32 %v658_v9, %v335_v11  ;;  %v347_v25 = vadd.f32 %v658_v9, %v336_v22  ;;  %v348_v26 = vadd.f32 %v658_v9, %v337_v23  ;;  %v494_v47 = vld [vmem:[%s915_s6] sm:$0xff] }
  0x1d   : > { %715 = vmatprep.subr.bf16.mxu0 %v758_v3 }
  0x1e   : > { %v349_v18 = vmax.f32 %v345_v14, 0.0  ;;  %v350_v19 = vmax.f32 %v346_v15, 0.0  ;;  %v351_v28 = vmax.f32 %v347_v25, 0.0  ;;  %v352_v29 = vmax.f32 %v348_v26, 0.0 }
  0x20   : > { %716 = vmatpush3.bf16.msra.mxu0 %v758_v3  ;;  %v353_v21 = vpack.c.bf16 %v350_v19, %v349_v18  ;;  %v354_v30 = vpack.c.bf16 %v352_v29, %v351_v28 }
  0x21   : > { %717 = vmatprep.subr.bf16.mxu0 %v759_v4 }
  0x22   : > { %727 = vmatprep.mubr.bf16.mxu0 %v353_v21 }
  0x24   : > { %718 = vmatpush3.bf16.msra.mxu0 %v759_v4 }
  0x25   : > { %719 = vmatprep.subr.bf16.mxu0 %v760_v13 }
  0x28   : > { %720 = vmatpush3.bf16.msra.mxu0 %v760_v13 }
  0x29   : > { %721 = vmatprep.subr.bf16.mxu0 %v761_v20 }
  0x2c   : > { %722 = vmatpush3.bf16.msra.mxu0 %v761_v20 }
  0x2d   : > { %723 = vmatprep.subr.bf16.mxu0 %v762_v24 }
  0x30   : > { %724 = vmatpush3.bf16.msra.mxu0 %v762_v24 }
  0x31   : > { %725 = vmatprep.subr.bf16.mxu0 %v763_v27 }
  0x34   : > { %726 = vmatpush3.bf16.msra.mxu0 %v763_v27 }
  0x37   : > { %728 = vmatmul.mubr.bf16.vlgmr.msra.gmra.mrb[0].mxu0 %v354_v30 }
 0x10a   : > { %v729_v31 = vpop.f32.mrb[0].mxu0 }
 0x10b   : > { %v453_v32 = vpop.f32.mrb[1].mxu0  ;;  %v497_v40 = vmul.f32 %v729_v31, %v729_v31 }
 0x10c   : > { %v730_v33 = vpop.f32.mrb[2].mxu0  ;;  %v495_v36 = vmul.f32 %v453_v32, %v453_v32 }
 0x10d   : > { %v697_v34 = vpack.c.bf16 %v730_v33, %v729_v31  ;;  %v456_v35 = vpop.f32.mrb[3].mxu0  ;;  %v498_v44 = vmul.f32 %v730_v33, %v730_v33 }
 0x10e   : > { %v692_v37 = vpack.c.bf16 %v456_v35, %v453_v32  ;;  %v489_v38 = vadd.f32 %v456_v35, %v453_v32  ;;  %v496_v39 = vmul.f32 %v456_v35, %v456_v35 }
 0x10f   : > { %700 = vst [vmem:[%s848_s8 + $0x8] sm:$0xff] %v697_v34  }
 0x110   : > { %693 = vst [vmem:[%s848_s8] sm:$0xff] %v692_v37   ;;  %v490_v41 = vadd.f32 %v729_v31, %v489_v38  ;;  %v499_v42 = vadd.f32 %v496_v39, %v495_v36 }
 0x112   : > { %v491_v45 = vadd.f32 %v730_v33, %v490_v41  ;;  %v500_v46 = vadd.f32 %v499_v42, %v497_v40 }
 0x114   : > { %v492_v48 = vadd.f32 %v491_v45, %v488_v43  ;;  %v501_v49 = vadd.f32 %v500_v46, %v498_v44 }
 0x116   : > { %493 = vst [vmem:[%s914_s5] sm:$0xff] %v492_v48  ;;  %v502_v50 = vadd.f32 %v501_v49, %v494_v47 }
 0x118   : > { %503 = vst [vmem:[%s915_s6] sm:$0xff] %v502_v50 }
 0x119 PF: > { %s17_s23 = sadd.s32 1, %s786_s23   ;;  %s916_s21 = smov %s782_s22 }
 0x11a   : > { %p14_p6 = scmp.ge.s32.totalorder %s17_s23, 6   ;;  %s917_s22 = smov %s919_s24 }
 0x11c   :  { %16 = sbr.rel (!%p14_p6) target bundleno = 2 (0x2), region = 94 }

// kernel: edge_conv_block.5
= control target key start
LH: loop header
LB: loop body
LE: loop exit
PB: predicated region body
PF: predicated region fallthrough
CT: control target
= control target key end

     0   :  { %s615_s21 = smov 0   ;;  %s617_s22 = smov 0   ;;  %s681_s0 = inlined_call_operand.vmem [shape: bf16[4,32,128], index: 0, kind: input, shape index: {}]   ;;  %s682_s1 = inlined_call_operand.vmem [shape: f32[1,128], index: 1, kind: input, shape index: {}]   ;;  %s683_s2 = inlined_call_operand.vmem [shape: f32[1,128], index: 2, kind: input, shape index: {}]   ;;  %s684_s3 = inlined_call_operand.vmem [shape: bf16[32,128], index: 3, kind: input, shape index: {}]   ;;  %s685_s4 = inlined_call_operand.vmem [shape: f32[1,128], index: 4, kind: input, shape index: {}]   ;;  %s686_s5 = inlined_call_operand.vmem [shape: f32[1,128], index: 5, kind: input, shape index: {}]   ;;  %s687_s6 = inlined_call_operand.vmem [shape: f32[32,128], index: 6, kind: output, shape index: {}]  }
   0x1   :  { %s619_s23 = smov 0  }
   0x2 LB: > { %s25_s24 = sadd.s32 1, %s573_s22  ;;  %p498_p0 = scmp.ge.s32.totalorder %s577_s23, 1  ;;  %s577_s23 = sphi %s619_s23, %s16_s23   ;;  %s573_s22 = sphi %s617_s22, %s689_s22   ;;  %s569_s21 = sphi %s615_s21, %s688_s21  }
   0x3   : > { %p26_p1 = scmp.ge.s32.totalorder %s25_s24, 4  ;;  %p242_p2 = scmp.lt.s32.totalorder %s577_s23, 5 }
   0x5   : > { %s691_s24 = smov (%p26_p1, %s25_s24), 0  ;;  %p243_p3 = pnand %p498_p0, %p242_p2 }
   0x6   : > { %p282_p4 = scmp.lt.s32.totalorder (!%p243_p3), %s569_s21, 3  ;;  %p501_p5 = scmp.ne.s32.totalorder (!%p243_p3), %s569_s21, 0 }
   0x7   : > { %246 = sbr.rel (%p243_p3) target bundleno = 49 (0x31), region = 44 }
   0xe   : > { %s283_s25 = scalar_select %p282_p4, %s569_s21, 3 }
   0xf   : > { %306 = sbr.rel (%p501_p5) target bundleno = 22 (0x16), region = 48  ;;  %v579_v0 = vmov (!%p501_p5), 0.0  }
  0x10   : > { %s511_s26 = sshll.u32 %s283_s25, 4  ;;  %307 = vst [vmem:[#allocation2] sm:$0xff] (!%p501_p5), %v579_v0  ;;  %308 = vst [vmem:[#allocation2 + $0x8] sm:$0xff] (!%p501_p5), %v579_v0 }
  0x11   : > { %s289_s29 = scalar_lea.vmem %s681_s0, %s511_s26  ;;  %309 = vst [vmem:[#allocation2 + $0x10] sm:$0xff] (!%p501_p5), %v579_v0  ;;  %310 = vst [vmem:[#allocation2 + $0x18] sm:$0xff] (!%p501_p5), %v579_v0 }
  0x16 PF: > { %v513_v1 = vld [vmem:[%s289_s29] sm:$0xff]   ;;  %v528_v6 = vld [vmem:[%s289_s29 + $0x8] sm:$0xff]   ;;  %p504_p6 = scmp.ne.s32.totalorder %s569_s21, 3 }
  0x17   : > { %v502_v2 = vld [vmem:[%s682_s1] ss:$0 sm:$0xff]  ;;  %v514_v3 = vunpack.c.l.bf16 %v513_v1  ;;  %v515_v4 = vunpack.c.h.bf16 %v513_v1  ;;  %v518_v9 = vunpack.c.l.bf16 %v528_v6  ;;  %v519_v10 = vunpack.c.h.bf16 %v528_v6  ;;  %v312_v16 = vld [vmem:[#allocation2 + $0x8] sm:$0xff] }
  0x18   : > { %v503_v5 = vld [vmem:[%s683_s2] ss:$0 sm:$0xff]  ;;  %v313_v21 = vld [vmem:[#allocation2 + $0x10] sm:$0xff]  ;;  %v314_v22 = vld [vmem:[#allocation2 + $0x18] sm:$0xff] }
  0x19   : > { %v330_v7 = vmul.f32 %v514_v3, %v502_v2  ;;  %v331_v8 = vmul.f32 %v515_v4, %v502_v2  ;;  %v332_v13 = vmul.f32 %v518_v9, %v502_v2  ;;  %v333_v14 = vmul.f32 %v519_v10, %v502_v2  ;;  %v311_v15 = vld [vmem:[#allocation2] sm:$0xff]  ;;  %v529_v38 = vld [vmem:[%s684_s3 + $0x8] sm:$0xff] (!%p504_p6)  }
  0x1a   : > { %v521_v30 = vld [vmem:[%s684_s3] sm:$0xff] (!%p504_p6)   ;;  %v526_v42 = vunpack.c.l.bf16 (!%p504_p6), %v529_v38  ;;  %v527_v44 = vunpack.c.h.bf16 (!%p504_p6), %v529_v38 }
  0x1b   : > { %v341_v11 = vadd.f32 %v503_v5, %v330_v7  ;;  %v342_v12 = vadd.f32 %v503_v5, %v331_v8  ;;  %v343_v19 = vadd.f32 %v503_v5, %v332_v13  ;;  %v344_v20 = vadd.f32 %v503_v5, %v333_v14  ;;  %v505_v31 = vld [vmem:[%s685_s4] ss:$0 sm:$0xff] (!%p504_p6) }
  0x1c   : > { %360 = sbr.rel (%p504_p6) target bundleno = 49 (0x31), region = 52  ;;  %v522_v32 = vunpack.c.l.bf16 (!%p504_p6), %v521_v30  ;;  %v523_v34 = vunpack.c.h.bf16 (!%p504_p6), %v521_v30  ;;  %v506_v36 = vld [vmem:[%s686_s5] ss:$0 sm:$0xff] (!%p504_p6)  ;;  %v386_v48 = vmul.f32 (!%p504_p6), %v526_v42, %v505_v31  ;;  %v387_v50 = vmul.f32 (!%p504_p6), %v527_v44, %v505_v31 }
  0x1d   : > { %v345_v17 = vmax.f32 %v341_v11, 0.0  ;;  %v346_v18 = vmax.f32 %v342_v12, 0.0  ;;  %v347_v25 = vmax.f32 %v343_v19, 0.0  ;;  %v348_v26 = vmax.f32 %v344_v20, 0.0 }
  0x1e   : > { %v384_v39 = vmul.f32 (!%p504_p6), %v522_v32, %v505_v31  ;;  %v385_v41 = vmul.f32 (!%p504_p6), %v523_v34, %v505_v31  ;;  %v397_v53 = vadd.f32 (!%p504_p6), %v506_v36, %v386_v48  ;;  %v398_v54 = vadd.f32 (!%p504_p6), %v506_v36, %v387_v50 }
  0x1f   : > { %v349_v23 = vadd.f32 %v345_v17, %v311_v15  ;;  %v350_v24 = vadd.f32 %v346_v18, %v312_v16  ;;  %v351_v27 = vadd.f32 %v347_v25, %v313_v21  ;;  %v352_v28 = vadd.f32 %v348_v26, %v314_v22 }
  0x20   : > { %v395_v45 = vadd.f32 (!%p504_p6), %v506_v36, %v384_v39  ;;  %v396_v46 = vadd.f32 (!%p504_p6), %v506_v36, %v385_v41 }
  0x21   : > { %353 = vst [vmem:[#allocation2] sm:$0xff] %v349_v23  ;;  %354 = vst [vmem:[#allocation2 + $0x8] sm:$0xff] %v350_v24 }
  0x22   : > { %355 = vst [vmem:[#allocation2 + $0x10] sm:$0xff] %v351_v27  ;;  %356 = vst [vmem:[#allocation2 + $0x18] sm:$0xff] %v352_v28 }
  0x28   : > { %v361_v29 = vld [vmem:[#allocation2] sm:$0xff]  ;;  %v362_v33 = vld [vmem:[#allocation2 + $0x8] sm:$0xff] }
  0x29   : > { %v365_v35 = vmul.f32 0.25, %v361_v29  ;;  %v363_v37 = vld [vmem:[#allocation2 + $0x10] sm:$0xff]  ;;  %v366_v40 = vmul.f32 0.25, %v362_v33  ;;  %v364_v43 = vld [vmem:[#allocation2 + $0x18] sm:$0xff] }
  0x2a   : > { %v367_v47 = vmul.f32 0.25, %v363_v37  ;;  %v368_v49 = vmul.f32 0.25, %v364_v43 }
  0x2b   : > { %v399_v51 = vadd.f32 %v395_v45, %v365_v35  ;;  %v400_v52 = vadd.f32 %v396_v46, %v366_v40 }
  0x2c   : > { %v401_v57 = vadd.f32 %v397_v53, %v367_v47  ;;  %v402_v58 = vadd.f32 %v398_v54, %v368_v49 }
  0x2d   : > { %v403_v55 = vmax.f32 %v399_v51, 0.0  ;;  %v404_v56 = vmax.f32 %v400_v52, 0.0 }
  0x2e   : > { %v405_v59 = vmax.f32 %v401_v57, 0.0  ;;  %v406_v60 = vmax.f32 %v402_v58, 0.0 }
  0x2f   : > { %407 = vst [vmem:[%s687_s6] sm:$0xff] %v403_v55  ;;  %408 = vst [vmem:[%s687_s6 + $0x8] sm:$0xff] %v404_v56 }
  0x30   : > { %409 = vst [vmem:[%s687_s6 + $0x10] sm:$0xff] %v405_v59  ;;  %410 = vst [vmem:[%s687_s6 + $0x18] sm:$0xff] %v406_v60 }
  0x31 PF: > { %s16_s23 = sadd.s32 1, %s577_s23   ;;  %s688_s21 = smov %s573_s22 }
  0x32   : > { %p13_p7 = scmp.ge.s32.totalorder %s16_s23, 6   ;;  %s689_s22 = smov %s691_s24 }
  0x34   :  { %15 = sbr.rel (!%p13_p7) target bundleno = 2 (0x2), region = 85 }

// kernel: edge_conv_block.3
= control target key start
LH: loop header
LB: loop body
LE: loop exit
PB: predicated region body
PF: predicated region fallthrough
CT: control target
= control target key end

     0   :  { %s1227_s13 = smov 0   ;;  %s1229_s14 = smov 0   ;;  %s1313_s0 = inlined_call_operand.vmem [shape: bf16[4,32,16], index: 0, kind: input, shape index: {}]   ;;  %s1314_s1 = inlined_call_operand.vmem [shape: bf16[32,16], index: 1, kind: input, shape index: {}]   ;;  %s1315_s2 = inlined_call_operand.vmem [shape: bf16[16,128], index: 2, kind: input, shape index: {}]   ;;  %s1316_s3 = inlined_call_operand.vmem [shape: bf16[16,128], index: 3, kind: input, shape index: {}]   ;;  %s1317_s4 = inlined_call_operand.vmem [shape: bf16[16,128], index: 4, kind: input, shape index: {}]   ;;  %s1318_s5 = inlined_call_operand.vmem [shape: bf16[4,32,128], index: 5, kind: output, shape index: {0}]   ;;  %s1319_s6 = inlined_call_operand.vmem [shape: f32[1,8,128], index: 6, kind: output, shape index: {1}]   ;;  %s1320_s7 = inlined_call_operand.vmem [shape: f32[1,8,128], index: 7, kind: output, shape index: {2}]   ;;  %s1321_s8 = inlined_call_operand.vmem [shape: bf16[32,128], index: 8, kind: output, shape index: {3}]   ;;  %s1322_s9 = inlined_call_operand.vmem [shape: f32[1,8,128], index: 9, kind: output, shape index: {4}]   ;;  %s1323_s10 = inlined_call_operand.vmem [shape: f32[1,8,128], index: 10, kind: output, shape index: {5}]  }
   0x1   :  { %s1231_s15 = smov 0  }
   0x2 LB: > { %s30_s16 = sadd.s32 1, %s1165_s14  ;;  %p1021_p0 = scmp.ge.s32.totalorder %s1169_s15, 1  ;;  %s1169_s15 = sphi %s1231_s15, %s21_s15   ;;  %s1165_s14 = sphi %s1229_s14, %s1325_s14   ;;  %s1161_s13 = sphi %s1227_s13, %s1324_s13  }
   0x3   : > { %p31_p1 = scmp.ge.s32.totalorder %s30_s16, 4  ;;  %p355_p2 = scmp.lt.s32.totalorder %s1169_s15, 5 }
   0x5   : > { %s1327_s16 = smov (%p31_p1, %s30_s16), 0  ;;  %p356_p3 = pnand %p1021_p0, %p355_p2 }
   0x6   : > { %p428_p4 = scmp.lt.s32.totalorder (!%p356_p3), %s1161_s13, 3  ;;  %p1026_p5 = scmp.ne.s32.totalorder (!%p356_p3), %s1161_s13, 0 }
   0x7   : > { %359 = sbr.rel (%p356_p3) target bundleno = 477 (0x1dd), region = 40 }
   0xe   : > { %s429_s17 = scalar_select %p428_p4, %s1161_s13, 3 }
   0xf   : > { %479 = sbr.rel (%p1026_p5) target bundleno = 244 (0xf4), region = 44  ;;  %v1140_v0 = vld [vmem:[%s1317_s4] sm:$0xff] (!%p1026_p5)   ;;  %vm504_vm0 = vcmask (!%p1026_p5), 130048   ;;  %v1142_v2 = vld [vmem:[%s1314_s1 + $0x8] sm:$0xff] (!%p1026_p5)   ;;  %v1171_v3 = vmov (!%p1026_p5), 0.0  }
  0x10   : > { %s1056_s18 = sshll.u32 %s429_s17, 4  ;;  %v1141_v1 = vld [vmem:[%s1314_s1] sm:$0xff] (!%p1026_p5)   ;;  %1103 = vmatprep.subr.bf16.mxu1 (!%p1026_p5), %v1140_v0  ;;  %480 = vst [vmem:[%s1319_s6] sm:$0xff] (!%p1026_p5), %v1171_v3  ;;  %481 = vst [vmem:[%s1320_s7] sm:$0xff] (!%p1026_p5), %v1171_v3 }
  0x11   : > { %s1248_s21 = scalar_lea.vmem %s1313_s0, %s1056_s18  ;;  %s1253_s24 = scalar_lea.vmem %s1318_s5, %s1056_s18  ;;  %1104 = vmatpush3.bf16.msra.mxu1 (!%p1026_p5), %v1140_v0  ;;  %1105 = vmatprep.mubr.msk.bf16.mxu1 (!%p1026_p5), %vm504_vm0, %v1141_v1  ;;  %v1143_v4 = vld [vmem:[%s1316_s3] sm:$0xff] (!%p1026_p5)  }
  0x12   : > { %1099 = vmatprep.mubr.msk.bf16.mxu0 (!%p1026_p5), %vm504_vm0, %v1141_v1  ;;  %1097 = vmatprep.subr.bf16.mxu0 (!%p1026_p5), %v1143_v4 }
  0x13   : > { %1098 = vmatpush3.bf16.msra.mxu0 (!%p1026_p5), %v1143_v4 }
  0x14   : > { %1106 = vmatmul.mubr.msk.bf16.vlgmr.msra.gmra.mrb[0].mxu1 (!%p1026_p5), %vm504_vm0, %v1142_v2 }
  0x16   : > { %1100 = vmatmul.mubr.msk.bf16.vlgmr.msra.gmra.mrb[0].mxu0 %vm504_vm0, %v1142_v2 }
  0xe7   : > { %v1107_v5 = vpop.f32.mrb[0].mxu1 }
  0xe8   : > { %v606_v6 = vpop.f32.mrb[1].mxu1  ;;  %v647_v17 = vmul.f32 %v1107_v5, %v1107_v5 }
  0xe9   : > { %v1108_v7 = vpop.f32.mrb[2].mxu1  ;;  %v1101_v10 = vpop.f32.mrb[0].mxu0  ;;  %v645_v11 = vmul.f32 %v606_v6, %v606_v6 }
  0xea   : > { %v1074_v8 = vpack.c.bf16 %v1108_v7, %v1107_v5  ;;  %v609_v9 = vpop.f32.mrb[3].mxu1  ;;  %562 = vst [vmem:[#allocation2 + $0x10] sm:$0xff] %v1101_v10  ;;  %v545_v15 = vpop.f32.mrb[1].mxu0  ;;  %v648_v21 = vmul.f32 %v1108_v7, %v1108_v7 }
  0xeb   : > { %v1069_v12 = vpack.c.bf16 %v609_v9, %v606_v6  ;;  %v641_v13 = vadd.f32 %v609_v9, %v606_v6  ;;  %v646_v14 = vmul.f32 %v609_v9, %v609_v9  ;;  %560 = vst [vmem:[#allocation2] sm:$0xff] %v545_v15  ;;  %v1102_v16 = vpop.f32.mrb[2].mxu0 }
  0xec   : > { %1086 = vst [vmem:[%s1321_s8 + $0x8] sm:$0xff] %v1074_v8   ;;  %563 = vst [vmem:[#allocation2 + $0x18] sm:$0xff] %v1102_v16  ;;  %v548_v20 = vpop.f32.mrb[3].mxu0 }
  0xed   : > { %1070 = vst [vmem:[%s1321_s8] sm:$0xff] %v1069_v12   ;;  %v642_v18 = vadd.f32 %v1107_v5, %v641_v13  ;;  %v649_v19 = vadd.f32 %v646_v14, %v645_v11  ;;  %561 = vst [vmem:[#allocation2 + $0x8] sm:$0xff] %v548_v20 }
  0xef   : > { %v643_v22 = vadd.f32 %v1108_v7, %v642_v18  ;;  %v650_v23 = vadd.f32 %v649_v19, %v647_v17 }
  0xf1   : > { %644 = vst [vmem:[%s1322_s9] sm:$0xff] %v643_v22  ;;  %v651_v24 = vadd.f32 %v650_v23, %v648_v21 }
  0xf3   : > { %652 = vst [vmem:[%s1323_s10] sm:$0xff] %v651_v24 }
  0xf4 PF: > { %v1144_v25 = vld [vmem:[%s1315_s2] sm:$0xff]   ;;  %vm679_vm1 = vcmask 130048   ;;  %v1146_v27 = vld [vmem:[%s1248_s21 + $0x8] sm:$0xff]   ;;  %v661_v29 = vld [vmem:[#allocation2 + $0x10] sm:$0xff] }
  0xf5   : > { %v1145_v26 = vld [vmem:[%s1248_s21] sm:$0xff]   ;;  %1109 = vmatprep.subr.bf16.mxu0 %v1144_v25  ;;  %v662_v31 = vld [vmem:[#allocation2 + $0x18] sm:$0xff]  ;;  %v660_v33 = vld [vmem:[#allocation2 + $0x8] sm:$0xff] }
  0xf6   : > { %1110 = vmatpush3.bf16.msra.mxu0 %v1144_v25  ;;  %1111 = vmatprep.mubr.msk.bf16.mxu0 %vm679_vm1, %v1145_v26  ;;  %v659_v28 = vld [vmem:[#allocation2] sm:$0xff] }
  0xf7   : > { %v755_v48 = vld [vmem:[%s1319_s6] sm:$0xff] }
  0xf8   : > { %v761_v52 = vld [vmem:[%s1320_s7] sm:$0xff] }
  0xf9   : > { %1112 = vmatmul.mubr.msk.bf16.vlgmr.msra.gmra.mrb[0].mxu0 %vm679_vm1, %v1146_v27 }
 0x1cc   : > { %v1113_v30 = vpop.f32.mrb[0].mxu0 }
 0x1cd   : > { %v720_v32 = vpop.f32.mrb[1].mxu0  ;;  %v729_v36 = vadd.f32 %v1113_v30, %v661_v29 }
 0x1ce   : > { %v721_v34 = vadd.f32 %v720_v32, %v659_v28  ;;  %v1114_v35 = vpop.f32.mrb[2].mxu0 }
 0x1cf   : > { %v732_v37 = vadd.f32 %v1114_v35, %v662_v31  ;;  %v723_v38 = vpop.f32.mrb[3].mxu0  ;;  %v764_v45 = vmul.f32 %v729_v36, %v729_v36 }
 0x1d0   : > { %v724_v39 = vadd.f32 %v723_v38, %v660_v33  ;;  %v762_v41 = vmul.f32 %v721_v34, %v721_v34 }
 0x1d1   : > { %v1084_v40 = vpack.c.bf16 %v732_v37, %v729_v36  ;;  %v765_v49 = vmul.f32 %v732_v37, %v732_v37 }
 0x1d2   : > { %v1079_v42 = vpack.c.bf16 %v724_v39, %v721_v34  ;;  %v756_v43 = vadd.f32 %v724_v39, %v721_v34  ;;  %v763_v44 = vmul.f32 %v724_v39, %v724_v39 }
 0x1d3   : > { %1087 = vst [vmem:[%s1253_s24 + $0x8] sm:$0xff] %v1084_v40  }
 0x1d4   : > { %1080 = vst [vmem:[%s1253_s24] sm:$0xff] %v1079_v42   ;;  %v757_v46 = vadd.f32 %v756_v43, %v729_v36  ;;  %v766_v47 = vadd.f32 %v763_v44, %v762_v41 }
 0x1d6   : > { %v758_v50 = vadd.f32 %v757_v46, %v732_v37  ;;  %v767_v51 = vadd.f32 %v766_v47, %v764_v45 }
 0x1d8   : > { %v759_v53 = vadd.f32 %v758_v50, %v755_v48  ;;  %v768_v54 = vadd.f32 %v767_v51, %v765_v49 }
 0x1da   : > { %760 = vst [vmem:[%s1319_s6] sm:$0xff] %v759_v53  ;;  %v769_v55 = vadd.f32 %v768_v54, %v761_v52 }
 0x1dc   : > { %770 = vst [vmem:[%s1320_s7] sm:$0xff] %v769_v55 }
 0x1dd PF: > { %s21_s15 = sadd.s32 1, %s1169_s15   ;;  %s1324_s13 = smov %s1165_s14 }
 0x1de   : > { %p18_p6 = scmp.ge.s32.totalorder %s21_s15, 6   ;;  %s1325_s14 = smov %s1327_s16 }
 0x1e0   :  { %20 = sbr.rel (!%p18_p6) target bundleno = 2 (0x2), region = 137 }

</bundles_post_ra>
